<compile_context>
chip_gen: v6e
topology: v6e:2x2x1
jax: 0.10.0
libtpu: 0.0.40
codegen_flags: <defaults>
</compile_context>

<pallas_src>
import math
import functools

import jax
import jax.numpy as jnp
from jax.experimental import pallas as pl
from jax.experimental.pallas import tpu as pltpu


# bf16 MXU inputs (accumulation is always f32).  Switch to jnp.float32 for
# bit-closer parity with the f32 PyTorch reference.
MATMUL_DTYPE = jnp.bfloat16
ACT_DTYPE = MATMUL_DTYPE           # storage dtype of short-lived activations

_LN_EPS = 1e-5


@functools.lru_cache(maxsize=None)
def _chip_config():
    """(row_tile_cap, vmem_limit_bytes, q_tile_cap) chosen from VMEM size."""
    try:
        vmem_cap = int(pltpu.get_tpu_info().vmem_capacity_bytes)
    except Exception:                        # conservative fallback, safe anywhere
        vmem_cap = 64 * 1024 * 1024
    if vmem_cap >= 96 * 1024 * 1024:         # v5e / v6e: 128 MiB VMEM
        return 1024, 64 * 1024 * 1024, 256
    return 512, 32 * 1024 * 1024, 128        # v7x: 64 MiB VMEM


def _dot(a, b):
    return jnp.dot(a.astype(MATMUL_DTYPE), b.astype(MATMUL_DTYPE),
                   preferred_element_type=jnp.float32)


def _dot_nt(a, b):
    """a @ b.T without materializing a transpose (contract last dims)."""
    return jax.lax.dot_general(
        a.astype(MATMUL_DTYPE), b.astype(MATMUL_DTYPE),
        (((1,), (1,)), ((), ())), preferred_element_type=jnp.float32)


def _layer_norm(z):
    mu = jnp.mean(z, axis=-1, keepdims=True)
    var = jnp.mean((z - mu) ** 2, axis=-1, keepdims=True)
    return (z - mu) * jax.lax.rsqrt(var + _LN_EPS)


def _cumsum_last(x):
    """Inclusive prefix sum along the last (lane) axis via log-step doubling.

    O(L^2 log L) VPU/lane-shift work; replaces the previous O(L^3) f32 matmul
    against a strictly-lower-triangular matrix.
    """
    n = x.shape[-1]
    shift = 1
    while shift < n:
        shifted = jnp.concatenate(
            [jnp.zeros(x.shape[:-1] + (shift,), x.dtype), x[..., :-shift]],
            axis=-1)
        x = x + shifted
        shift *= 2
    return x


# ----------------------------- Pallas kernels ------------------------------

def _kv_proj_kernel(kin_ref, vin_ref, kw_ref, kb_ref, vw_ref, vb_ref,
                    k_out, v_out):
    """K(=Q) and V projections fused into one call, two lane-dense outputs."""
    k_out[...] = (_dot(kin_ref[...], kw_ref[...]) + kb_ref[...]).astype(k_out.dtype)
    v_out[...] = (_dot(vin_ref[...], vw_ref[...]) + vb_ref[...]).astype(v_out.dtype)


def _proj_res_ln_kernel(attn_ref, res_ref, w_ref, b_ref, o_ref):
    """out = LayerNorm(residual + attn @ out_w + out_b)."""
    y = _dot(attn_ref[...], w_ref[...]) + b_ref[...]
    o_ref[...] = _layer_norm(res_ref[...] + y).astype(o_ref.dtype)


def _ffn_res_ln_kernel(x_ref, w1_ref, b1_ref, w2_ref, b2_ref, o_ref):
    """out = LayerNorm(x + relu(x @ w1 + b1) @ w2 + b2)."""
    x = x_ref[...]
    h = jnp.maximum(_dot(x, w1_ref[...]) + b1_ref[...], 0.0)
    z = x + _dot(h, w2_ref[...]) + b2_ref[...]
    o_ref[...] = _layer_norm(z).astype(o_ref.dtype)


def _head_kernel(x_ref, s_ref, w1a_ref, w1b_ref, b1_ref,
                 w2_ref, b2_ref, w3_ref, b3_ref, o_ref):
    """Full 3-layer output head (concat handled via split w1)."""
    h = _dot(x_ref[...], w1a_ref[...]) + _dot(s_ref[...], w1b_ref[...]) + b1_ref[...]
    h = jnp.maximum(h, 0.0)
    h = jnp.maximum(_dot(h, w2_ref[...]) + b2_ref[...], 0.0)
    # 256 -> 1 matvec as a lane reduction (avoids a degenerate MXU call and a
    # lane-sparse MXU epilogue).
    logit = jnp.sum(h * w3_ref[...], axis=-1, keepdims=True) + b3_ref[...]
    o_ref[...] = logit.astype(o_ref.dtype)


def _attention_kernel(gamma_ref, q_ref, k_ref, v_ref, o_ref,
                      *, n_heads, d_k, mask_k):
    """AKT distance-decayed attention; one (batch, query-tile) per grid step.

    q_ref: (1, TQ, d) rows of the K(=Q) projection for this query tile.
    k_ref / v_ref: (1, L, d) full K / V projections for this batch element.
    o_ref: (1, TQ, d) attention output in concat (head-interleaved-lane) layout.
    """
    tq = q_ref.shape[1]
    L = k_ref.shape[1]
    scale = 1.0 / math.sqrt(d_k)
    zero_pad = (mask_k == 0)

    # Batch/head-invariant (TQ, L) masks, computed once per grid step.
    row0 = (pl.program_id(1) * tq).astype(jnp.float32)
    r = row0 + jax.lax.broadcasted_iota(jnp.float32, (tq, L), 0)   # global row i
    c = jax.lax.broadcasted_iota(jnp.float32, (tq, L), 1)          # col j
    delta = c - r
    # np.triu(ones, k=mask_k) == 0  ->  allow where (j - i) < mask_k
    allow = delta < float(mask_k)
    allow_f = allow.astype(jnp.float32)
    pos_eff = jnp.abs(delta)
    neg_bias = jnp.where(allow, 0.0, -1e32)                        # additive mask
    if zero_pad:
        row_keep = (r[:, :1] != 0.0).astype(jnp.float32)           # (TQ, 1)

    for h in range(n_heads):
        lo, hi = h * d_k, (h + 1) * d_k
        qh = q_ref[0, :, lo:hi]                                    # (TQ, d_k)
        kh = k_ref[0, :, lo:hi]                                    # (L,  d_k)
        vh = v_ref[0, :, lo:hi]                                    # (L,  d_k)

        scores = _dot_nt(qh, kh) * scale                           # (TQ, L) f32

        # distance-decay statistics: softmax of the UNMASKED scores, then
        # * mask (matches the reference, whose masked_fill result is unused).
        m1 = jnp.max(scores, axis=-1, keepdims=True)
        e1 = jnp.exp(scores - m1)
        p = e1 * pl.reciprocal(jnp.sum(e1, axis=-1, keepdims=True), approx=True)
        p = p * allow_f

        total = jnp.sum(p, axis=-1, keepdims=True)                 # disttotal
        rem = total - _cumsum_last(p)                              # - distcum
        dist = jnp.sqrt(jnp.maximum(rem * pos_eff, 0.0))

        gamma = gamma_ref[h]                                       # -softplus(gammas[h])
        total_effect = jnp.clip(jnp.exp(dist * gamma), 1e-5, 1e5)

        # masked softmax of the decayed scores (additive bias, no per-head select)
        s2 = scores * total_effect + neg_bias
        m2 = jnp.max(s2, axis=-1, keepdims=True)
        e2 = jnp.exp(s2 - m2)
        attn = e2 * pl.reciprocal(jnp.sum(e2, axis=-1, keepdims=True), approx=True)
        if zero_pad:
            attn = attn * row_keep

        out_h = jnp.dot(attn.astype(MATMUL_DTYPE), vh.astype(MATMUL_DTYPE),
                        preferred_element_type=jnp.float32)        # (TQ, d_k)
        o_ref[0, :, lo:hi] = out_h.astype(o_ref.dtype)             # direct per-head store


# ----------------------------- pallas wrappers ------------------------------

def _row_params(vmem_limit):
    return pltpu.CompilerParams(dimension_semantics=("parallel",),
                                vmem_limit_bytes=vmem_limit)


def _rows_call(kernel, row_args, const_args, dout, cap, vmem_limit,
               out_dtype=jnp.float32):
    """Row-tiled pallas_call: row_args tiled over rows, const_args resident."""
    N = row_args[0].shape[0]
    tm = min(N, cap)
    grid = (pl.cdiv(N, tm),)
    in_specs = ([pl.BlockSpec((tm, a.shape[1]), lambda i: (i, 0)) for a in row_args]
                + [pl.BlockSpec(a.shape, lambda i: (0, 0)) for a in const_args])
    return pl.pallas_call(
        kernel,
        out_shape=jax.ShapeDtypeStruct((N, dout), out_dtype),
        grid=grid,
        in_specs=in_specs,
        out_specs=pl.BlockSpec((tm, dout), lambda i: (i, 0)),
        compiler_params=_row_params(vmem_limit),
    )(*row_args, *const_args)


def _kv_proj(key_rows, val_rows, kw, kb, vw, vb, cap, vmem_limit):
    """Fused K(=Q) / V projections; two lane-dense (N, d) outputs (ACT_DTYPE)."""
    N, d = key_rows.shape
    tm = min(N, cap)
    grid = (pl.cdiv(N, tm),)
    kb2 = kb.reshape(1, d)
    vb2 = vb.reshape(1, d)
    row_spec = pl.BlockSpec((tm, d), lambda i: (i, 0))
    const = lambda a: pl.BlockSpec(a.shape, lambda i: (0, 0))
    return pl.pallas_call(
        _kv_proj_kernel,
        out_shape=(jax.ShapeDtypeStruct((N, d), ACT_DTYPE),
                   jax.ShapeDtypeStruct((N, d), ACT_DTYPE)),
        grid=grid,
        in_specs=[row_spec, row_spec, const(kw), const(kb2), const(vw), const(vb2)],
        out_specs=(pl.BlockSpec((tm, d), lambda i: (i, 0)),
                   pl.BlockSpec((tm, d), lambda i: (i, 0))),
        compiler_params=_row_params(vmem_limit),
    )(key_rows, val_rows, kw, kb2, vw, vb2)


def akt_attention(gamma, k, v, *, n_heads, mask_k, tq_cap, vmem_limit):
    """gamma: (H,) f32 (already -softplus); k, v: (bs, L, d) -> (bs, L, d)."""
    bs, L, d = k.shape
    d_k = d // n_heads
    tq = L if L <= tq_cap else tq_cap          # full dim or a multiple of 8
    nq = pl.cdiv(L, tq)
    kern = functools.partial(_attention_kernel, n_heads=n_heads, d_k=d_k,
                             mask_k=mask_k)
    return pl.pallas_call(
        kern,
        out_shape=jax.ShapeDtypeStruct((bs, L, d), ACT_DTYPE),
        grid_spec=pltpu.PrefetchScalarGridSpec(
            num_scalar_prefetch=1,
            grid=(bs, nq),
            in_specs=[pl.BlockSpec((1, tq, d), lambda b, i, g: (b, i, 0)),  # Q tile (kq_same)
                      pl.BlockSpec((1, L, d), lambda b, i, g: (b, 0, 0)),   # full K
                      pl.BlockSpec((1, L, d), lambda b, i, g: (b, 0, 0))],  # full V
            out_specs=pl.BlockSpec((1, tq, d), lambda b, i, g: (b, i, 0)),
        ),
        compiler_params=pltpu.CompilerParams(
            dimension_semantics=("parallel", "parallel"),
            vmem_limit_bytes=vmem_limit),
    )(gamma, k, k, v)


# ------------------------------ model glue ---------------------------------

def transformer_layer(p, mask_k, query, key, values, apply_pos, n_heads, cfg):
    bs, L, d = query.shape
    N = bs * L
    cap, vmem_limit, tq_cap = cfg
    mha = p['mha']

    # K(=Q) from `key` (== `query` at every call site, kq_same) and V from
    # `values`, fused into one call with two lane-dense outputs.
    k_rows, v_rows = _kv_proj(key.reshape(N, d), values.reshape(N, d),
                              mha['k_w'], mha['k_b'], mha['v_w'], mha['v_b'],
                              cap, vmem_limit)

    gamma = -jax.nn.softplus(mha['gammas'])                      # (H,)
    attn = akt_attention(gamma, k_rows.reshape(bs, L, d), v_rows.reshape(bs, L, d),
                         n_heads=n_heads, mask_k=mask_k,
                         tq_cap=tq_cap, vmem_limit=vmem_limit)   # (bs, L, d)

    # out_proj + residual + LayerNorm fused.
    x = _rows_call(_proj_res_ln_kernel,
                   [attn.reshape(N, d), query.reshape(N, d)],
                   [mha['out_w'], mha['out_b'].reshape(1, d)],
                   d, cap, vmem_limit)

    if apply_pos:
        # linear1 + ReLU + linear2 + residual + LayerNorm fused.
        x = _rows_call(_ffn_res_ln_kernel, [x],
                       [p['w1'], p['b1'].reshape(1, -1),
                        p['w2'], p['b2'].reshape(1, -1)],
                       d, cap, vmem_limit)
    return x.reshape(bs, L, d)


def akt_forward(params, s_data, sa_data, target, n_skill, n_heads):
    # TODO(synk): embedding gathers and the masked-BCE reduction stay in XLA;
    # the boolean-mask gather in the loss is replaced by a mask-weighted sum
    # (numerically identical).  Dropout layers are identity (eval mode).
    cfg = _chip_config()
    s_emb = params['s_embed'][s_data]                            # (bs, L, d)
    answer = (sa_data - s_data) // n_skill                       # separate_sa = False
    sa_emb = params['sa_embed'][answer] + s_emb

    # Architecture
    y = sa_emb
    x = s_emb
    for blk in params['blocks_1']:
        y = transformer_layer(blk, 1, y, y, y, True, n_heads, cfg)
    b2 = params['blocks_2']
    for i in range(0, len(b2), 2):
        x = transformer_layer(b2[i], 1, x, x, x, False, n_heads, cfg)
        x = transformer_layer(b2[i + 1], 0, x, x, y, True, n_heads, cfg)

    # output head (all three layers, incl. the 256->1 matvec, in one kernel)
    bs, L, d = x.shape
    N = bs * L
    cap, vmem_limit, _ = cfg
    w1 = params['out_w1']
    logits = _rows_call(
        _head_kernel,
        [x.reshape(N, d), s_emb.reshape(N, d)],
        [w1[:d], w1[d:], params['out_b1'].reshape(1, -1),
         params['out_w2'], params['out_b2'].reshape(1, -1),
         params['out_w3'].reshape(1, -1), params['out_b3'].reshape(1, 1)],
        1, cap, vmem_limit).reshape(-1)

    labels = target.reshape(-1)
    valid = labels > -0.9
    # BCEWithLogitsLoss(reduction='none') on the valid entries, then sum.
    bce = jnp.maximum(logits, 0.0) - logits * labels + jnp.log1p(jnp.exp(-jnp.abs(logits)))
    loss_sum = jnp.sum(jnp.where(valid, bce, 0.0))
    preds = jax.nn.sigmoid(logits)
    return loss_sum, preds, jnp.sum(valid.astype(jnp.int32))


# ----------------------------- parameter init ------------------------------

def xavier(key, shape):
    fan_in, fan_out = shape[0], shape[1]
    a = math.sqrt(6.0 / (fan_in + fan_out))
    return jax.random.uniform(key, shape, jnp.float32, -a, a)


def init_mha(key, d_model, n_heads):
    ks = jax.random.split(key, 4)
    return dict(
        k_w=xavier(ks[0], (d_model, d_model)), k_b=jnp.zeros((d_model,), jnp.float32),
        v_w=xavier(ks[1], (d_model, d_model)), v_b=jnp.zeros((d_model,), jnp.float32),
        out_w=xavier(ks[2], (d_model, d_model)), out_b=jnp.zeros((d_model,), jnp.float32),
        gammas=jax.random.uniform(ks[3], (n_heads,), jnp.float32, -1.0, 1.0),
    )


def init_layer(key, d_model, d_ff, n_heads):
    ks = jax.random.split(key, 3)
    return dict(
        mha=init_mha(ks[0], d_model, n_heads),
        w1=xavier(ks[1], (d_model, d_ff)), b1=jnp.zeros((d_ff,), jnp.float32),
        w2=xavier(ks[2], (d_ff, d_model)), b2=jnp.zeros((d_model,), jnp.float32),
    )


# ---------------------------------- main -----------------------------------

if __name__ == "__main__":
    n_skill = 10
    d_model = 32
    n_heads = 2
    d_ff = 64
    final_fc_dim = 64
    bs, L = 2, 8

    key = jax.random.PRNGKey(0)
    keys = jax.random.split(key, 12)

    params = {
        's_embed': jax.random.normal(keys[0], (n_skill + 1, d_model), jnp.float32) * 0.1,
        'sa_embed': jax.random.normal(keys[1], (2, d_model), jnp.float32) * 0.1,
        'blocks_1': [init_layer(keys[2], d_model, d_ff, n_heads)],
        'blocks_2': [init_layer(keys[3], d_model, d_ff, n_heads),
                     init_layer(keys[4], d_model, d_ff, n_heads)],
        'out_w1': xavier(keys[5], (2 * d_model, final_fc_dim)),
        'out_b1': jnp.zeros((final_fc_dim,), jnp.float32),
        'out_w2': xavier(keys[6], (final_fc_dim, 256)),
        'out_b2': jnp.zeros((256,), jnp.float32),
        'out_w3': xavier(keys[7], (256, 1)),
        'out_b3': jnp.zeros((1,), jnp.float32),
    }

    s_data = jax.random.randint(keys[8], (bs, L), 1, n_skill + 1)
    answer = jax.random.randint(keys[9], (bs, L), 0, 2)
    sa_data = s_data + answer * n_skill
    target = answer.astype(jnp.float32).at[:, -1].set(-1.0)   # last step masked out

    loss_sum, preds, n_valid = akt_forward(params, s_data, sa_data, target,
                                           n_skill, n_heads)
    jax.block_until_ready((loss_sum, preds, n_valid))
    print("KERNEL_OK")
</pallas_src>

<mosaic_0001>
module attributes {stable_mosaic.version = 11 : i64} {
  func.func @_kv_proj_kernel(%arg0: i32, %arg1: memref<16x32xf32, #tpu.memory_space<vmem>>, %arg2: memref<16x32xf32, #tpu.memory_space<vmem>>, %arg3: memref<32x32xf32, #tpu.memory_space<vmem>>, %arg4: memref<1x32xf32, #tpu.memory_space<vmem>>, %arg5: memref<32x32xf32, #tpu.memory_space<vmem>>, %arg6: memref<1x32xf32, #tpu.memory_space<vmem>>, %arg7: memref<16x32xbf16, #tpu.memory_space<vmem>>, %arg8: memref<16x32xbf16, #tpu.memory_space<vmem>>) attributes {dimension_semantics = [#tpu.dimension_semantics<parallel>], iteration_bounds = array<i64: 1>, scalar_prefetch = 0 : i64, scratch_operands = 0 : i64, tpu.core_type = #tpu.core_type<tc>, window_params = [{transform_indices = @transform_0, window_bounds = array<i64: 16, 32>}, {transform_indices = @transform_1, window_bounds = array<i64: 16, 32>}, {pipeline_mode = #tpu.pipeline_mode<synchronous>, transform_indices = @transform_2, window_bounds = array<i64: 32, 32>}, {pipeline_mode = #tpu.pipeline_mode<synchronous>, transform_indices = @transform_3, window_bounds = array<i64: 1, 32>}, {pipeline_mode = #tpu.pipeline_mode<synchronous>, transform_indices = @transform_4, window_bounds = array<i64: 32, 32>}, {pipeline_mode = #tpu.pipeline_mode<synchronous>, transform_indices = @transform_5, window_bounds = array<i64: 1, 32>}, {transform_indices = @transform_6, window_bounds = array<i64: 16, 32>}, {transform_indices = @transform_7, window_bounds = array<i64: 16, 32>}]} {
    %c0 = arith.constant 0 : index
    %c0_0 = arith.constant 0 : index
    %0 = vector.load %arg1[%c0, %c0_0] : memref<16x32xf32, #tpu.memory_space<vmem>>, vector<16x32xf32>
    %c0_1 = arith.constant 0 : index
    %c0_2 = arith.constant 0 : index
    %1 = vector.load %arg3[%c0_1, %c0_2] : memref<32x32xf32, #tpu.memory_space<vmem>>, vector<32x32xf32>
    %2 = arith.truncf %0 : vector<16x32xf32> to vector<16x32xbf16>
    %3 = arith.truncf %1 : vector<32x32xf32> to vector<32x32xbf16>
    %cst = arith.constant dense<0.000000e+00> : vector<16x32xf32>
    %4 = tpu.matmul %2, %3, %cst {dimension_numbers = #tpu.dot_dimension_numbers<[1], [0], [0], [1], [0, 0, 1, 1], [], []>} : vector<16x32xbf16>, vector<32x32xbf16>, vector<16x32xf32> -> vector<16x32xf32>
    %c0_3 = arith.constant 0 : index
    %c0_4 = arith.constant 0 : index
    %5 = vector.load %arg4[%c0_3, %c0_4] : memref<1x32xf32, #tpu.memory_space<vmem>>, vector<1x32xf32>
    %6 = vector.broadcast %5 : vector<1x32xf32> to vector<16x32xf32>
    %7 = arith.addf %4, %6 : vector<16x32xf32>
    %8 = arith.truncf %7 : vector<16x32xf32> to vector<16x32xbf16>
    %c0_5 = arith.constant 0 : index
    %c0_6 = arith.constant 0 : index
    %9 = vector.load %arg7[%c0_5, %c0_6] : memref<16x32xbf16, #tpu.memory_space<vmem>>, vector<16x32xbf16>
    tpu.vector_store %arg7[%c0_5, %c0_6], %8 {strides = array<i32>} : memref<16x32xbf16, #tpu.memory_space<vmem>>, vector<16x32xbf16>,
    %c0_7 = arith.constant 0 : index
    %c0_8 = arith.constant 0 : index
    %10 = vector.load %arg2[%c0_7, %c0_8] : memref<16x32xf32, #tpu.memory_space<vmem>>, vector<16x32xf32>
    %c0_9 = arith.constant 0 : index
    %c0_10 = arith.constant 0 : index
    %11 = vector.load %arg5[%c0_9, %c0_10] : memref<32x32xf32, #tpu.memory_space<vmem>>, vector<32x32xf32>
    %12 = arith.truncf %10 : vector<16x32xf32> to vector<16x32xbf16>
    %13 = arith.truncf %11 : vector<32x32xf32> to vector<32x32xbf16>
    %cst_11 = arith.constant dense<0.000000e+00> : vector<16x32xf32>
    %14 = tpu.matmul %12, %13, %cst_11 {dimension_numbers = #tpu.dot_dimension_numbers<[1], [0], [0], [1], [0, 0, 1, 1], [], []>} : vector<16x32xbf16>, vector<32x32xbf16>, vector<16x32xf32> -> vector<16x32xf32>
    %c0_12 = arith.constant 0 : index
    %c0_13 = arith.constant 0 : index
    %15 = vector.load %arg6[%c0_12, %c0_13] : memref<1x32xf32, #tpu.memory_space<vmem>>, vector<1x32xf32>
    %16 = vector.broadcast %15 : vector<1x32xf32> to vector<16x32xf32>
    %17 = arith.addf %14, %16 : vector<16x32xf32>
    %18 = arith.truncf %17 : vector<16x32xf32> to vector<16x32xbf16>
    %c0_14 = arith.constant 0 : index
    %c0_15 = arith.constant 0 : index
    %19 = vector.load %arg8[%c0_14, %c0_15] : memref<16x32xbf16, #tpu.memory_space<vmem>>, vector<16x32xbf16>
    tpu.vector_store %arg8[%c0_14, %c0_15], %18 {strides = array<i32>} : memref<16x32xbf16, #tpu.memory_space<vmem>>, vector<16x32xbf16>,
    return
  }
  func.func @transform_0(%arg0: i32) -> (i32, i32) {
    %c0_i32 = arith.constant 0 : i32
    %c0_i32_0 = arith.constant 0 : i32
    return %arg0, %c0_i32 : i32, i32
  }
  func.func @transform_1(%arg0: i32) -> (i32, i32) {
    %c0_i32 = arith.constant 0 : i32
    %c0_i32_0 = arith.constant 0 : i32
    return %arg0, %c0_i32 : i32, i32
  }
  func.func @transform_2(%arg0: i32) -> (i32, i32) {
    %c0_i32 = arith.constant 0 : i32
    %c0_i32_0 = arith.constant 0 : i32
    %c0_i32_1 = arith.constant 0 : i32
    return %c0_i32, %c0_i32_0 : i32, i32
  }
  func.func @transform_3(%arg0: i32) -> (i32, i32) {
    %c0_i32 = arith.constant 0 : i32
    %c0_i32_0 = arith.constant 0 : i32
    %c0_i32_1 = arith.constant 0 : i32
    return %c0_i32, %c0_i32_0 : i32, i32
  }
  func.func @transform_4(%arg0: i32) -> (i32, i32) {
    %c0_i32 = arith.constant 0 : i32
    %c0_i32_0 = arith.constant 0 : i32
    %c0_i32_1 = arith.constant 0 : i32
    return %c0_i32, %c0_i32_0 : i32, i32
  }
  func.func @transform_5(%arg0: i32) -> (i32, i32) {
    %c0_i32 = arith.constant 0 : i32
    %c0_i32_0 = arith.constant 0 : i32
    %c0_i32_1 = arith.constant 0 : i32
    return %c0_i32, %c0_i32_0 : i32, i32
  }
  func.func @transform_6(%arg0: i32) -> (i32, i32) {
    %c0_i32 = arith.constant 0 : i32
    %c0_i32_0 = arith.constant 0 : i32
    return %arg0, %c0_i32 : i32, i32
  }
  func.func @transform_7(%arg0: i32) -> (i32, i32) {
    %c0_i32 = arith.constant 0 : i32
    %c0_i32_0 = arith.constant 0 : i32
    return %arg0, %c0_i32 : i32, i32
  }
}

</mosaic_0001>

<bundles_post_ra>
// kernel: tpu_custom_call.1
= control target key start
LH: loop header
LB: loop body
LE: loop exit
PB: predicated region body
PF: predicated region fallthrough
CT: control target
= control target key end

     0   :  { %13 = vsyncpa [#allocation3], 0  ;;  %s528_s0 = inlined_call_operand.hbm [shape: f32[16,32], index: 0, kind: input, shape index: {}]   ;;  %s529_s1 = inlined_call_operand.hbm [shape: f32[16,32], index: 1, kind: input, shape index: {}]   ;;  %s530_s2 = inlined_call_operand.hbm [shape: f32[32,32], index: 2, kind: input, shape index: {}]   ;;  %s531_s3 = inlined_call_operand.vmem [shape: f32[1,32], index: 3, kind: input, shape index: {}]   ;;  %s532_s4 = inlined_call_operand.hbm [shape: f32[32,32], index: 4, kind: input, shape index: {}]   ;;  %s533_s5 = inlined_call_operand.vmem [shape: f32[1,32], index: 5, kind: input, shape index: {}]   ;;  %s534_s6 = inlined_call_operand.hbm [shape: bf16[16,32], index: 6, kind: output, shape index: {0}]   ;;  %s535_s7 = inlined_call_operand.hbm [shape: bf16[16,32], index: 7, kind: output, shape index: {1}]  }
   0x1   :  { %14 = vsyncpa [#allocation6], 0 }
   0x2   :  { %15 = vsyncpa [#allocation9], 0 }
   0x3   :  { %16 = vsyncpa [#allocation4], 0 }
   0x4   :  { %17 = vsyncpa [#allocation12], 0  ;;  %s436_s24 = smov [#allocation5]   ;;  %s437_s26 = smov [#allocation2]  }
   0x5   :  { %s35_s25 = sshll.u32 %s436_s24, 4  ;;  %s23_s27 = sshll.u32 %s437_s26, 4  ;;  %s36_s25 = int_to_ptr.vmem [resolvable:$true] %s35_s25  ;;  %s24_s27 = int_to_ptr.vmem [resolvable:$true] %s23_s27 }
   0x6   :  { %s314_s28 = scalar_lea.vmem %s36_s25, 256  ;;  %p319_p1 = scmp.lt.s32.totalorder %s36_s25, %s36_s25 }
   0x7   :  { %p315_p0 = scmp.ne.s32.totalorder %s36_s25, %s314_s28  ;;  %p320_p2 = scmp.lt.s32.totalorder %s314_s28, %s314_s28 }
   0x9   :  { %p321_p3 = por %p320_p2, %p319_p1 }
   0xb   :  { %p322_p4 = pnand %p321_p3, %p315_p0 }
   0xd   :  { %325 = shalt.err (!%p322_p4)
}
   0xe   :  { %s438_s29 = smov 128   ;;  %s439_s30 = smov 8  }
   0xf   :  { %41 = dma.hbm_to_vmem [thread:$0]  %s529_s1, 256, %s36_s25, [#allocation6], %s438_s29, %s438_s29, %s439_s30  }
  0x10   :  { %s334_s10 = scalar_lea.vmem %s24_s27, 256  ;;  %p339_p6 = scmp.lt.s32.totalorder %s24_s27, %s24_s27 }
  0x11   :  { %p335_p5 = scmp.ne.s32.totalorder %s24_s27, %s334_s10  ;;  %p340_p7 = scmp.lt.s32.totalorder %s334_s10, %s334_s10 }
  0x13   :  { %p341_p8 = por %p340_p7, %p339_p6 }
  0x15   :  { %p342_p9 = pnand %p341_p8, %p335_p5 }
  0x17   :  { %345 = shalt.err (!%p342_p9)
}
  0x18   :  { %29 = dma.hbm_to_vmem [thread:$0]  %s528_s0, 256, %s24_s27, [#allocation3], %s438_s29, %s438_s29, %s439_s30  }
  0x19   :  { %s440_s13 = smov [#allocation7]   ;;  %s441_s15 = smov [#allocation8]  }
  0x1a   :  { %s47_s14 = sshll.u32 %s440_s13, 4  ;;  %s61_s16 = sshll.u32 %s441_s15, 4  ;;  %s48_s14 = int_to_ptr.vmem [resolvable:$true] %s47_s14  ;;  %s62_s16 = int_to_ptr.vmem [resolvable:$true] %s61_s16 }
  0x1b   :  { %s354_s1 = scalar_lea.vmem %s48_s14, 512  ;;  %p359_p11 = scmp.lt.s32.totalorder %s48_s14, %s48_s14 }
  0x1c   :  { %p355_p10 = scmp.ne.s32.totalorder %s48_s14, %s354_s1  ;;  %p360_p12 = scmp.lt.s32.totalorder %s354_s1, %s354_s1 }
  0x1e   :  { %p361_p13 = por %p360_p12, %p359_p11 }
  0x20   :  { %p362_p0 = pnand %p361_p13, %p355_p10 }
  0x22   :  { %365 = shalt.err (!%p362_p0)
}
  0x23   :  { %53 = dma.hbm_to_vmem [thread:$0]  %s530_s2, 512, %s48_s14, [#allocation6], %s438_s29, %s438_s29, %s439_s30  }
  0x24   :  { %s374_s0 = scalar_lea.vmem %s62_s16, 512  ;;  %p379_p2 = scmp.lt.s32.totalorder %s62_s16, %s62_s16 }
  0x25   :  { %p375_p1 = scmp.ne.s32.totalorder %s62_s16, %s374_s0  ;;  %p380_p3 = scmp.lt.s32.totalorder %s374_s0, %s374_s0 }
  0x27   :  { %p381_p4 = por %p380_p3, %p379_p2 }
  0x29   :  { %p382_p5 = pnand %p381_p4, %p375_p1 }
  0x2b   :  { %385 = shalt.err (!%p382_p5)
}
  0x2c   :  { %67 = dma.hbm_to_vmem [thread:$0]  %s532_s4, 512, %s62_s16, [#allocation9], %s438_s29, %s438_s29, %s439_s30  }
  0x2d   :  { %426 = dma.done.wait [#allocation3], 256  }
  0x2e   :  { %427 = vsyncadd [#allocation3], 4294967040 }
  0x2f   :  { %428 = dma.done.wait [#allocation6], 768  }
  0x30   :  { %429 = vsyncadd [#allocation6], 4294966528 }
  0x31   :  { %430 = dma.done.wait [#allocation9], 512  }
  0x32   :  { %431 = vsyncadd [#allocation9], 4294966784  ;;  %v442_v0 = vmov 0.0   ;;  %vm443_vm0 = vmmov 0   ;;  %v87_v1 = vld [vmem:[#allocation7 + $0x10] sm:$0xff]  ;;  %v88_v2 = vld [vmem:[#allocation7 + $0x18] sm:$0xff] }
  0x33   :  { %278 = vmatprep.subr.bf16.mxu0 %v442_v0  ;;  %286 = vmatprep.subr.bf16.mxu1 %v442_v0  ;;  %v159_v3 = vld [vmem:[#allocation8 + $0x10] sm:$0xff]  ;;  %v91_v4 = vpack.c.bf16 %v88_v2, %v87_v1  ;;  %v160_v5 = vld [vmem:[#allocation8 + $0x18] sm:$0xff]  ;;  %v85_v6 = vld [vmem:[#allocation7] sm:$0xff]  ;;  %vm99_vm1 = vcmask 261120   ;;  %vm152_vm2 = vcmask 257024   ;;  %s444_s23 = smov [#allocation10]  }
  0x34   :  { %282 = vmatprep.mubr.msk.bf16.mxu0 %vm443_vm0, %v442_v0  ;;  %290 = vmatprep.mubr.msk.bf16.mxu1 %vm443_vm0, %v442_v0  ;;  %v86_v7 = vld [vmem:[#allocation7 + $0x8] sm:$0xff]  ;;  %v163_v8 = vpack.c.bf16 %v160_v5, %v159_v3  ;;  %v157_v9 = vld [vmem:[#allocation8] sm:$0xff]  ;;  %v155_v15 = vld [vmem:[#allocation5] sm:$0xff]  ;;  %s230_s24 = sshll.u32 %s444_s23, 4  ;;  %s231_s24 = int_to_ptr.vmem [resolvable:$true] %s230_s24 }
  0x35   :  { %v158_v10 = vld [vmem:[#allocation8 + $0x8] sm:$0xff]  ;;  %279 = vmatpush3.bf16.msra.mxu0 %v91_v4  ;;  %v90_v11 = vpack.c.bf16 %v86_v7, %v85_v6  ;;  %v83_v12 = vld [vmem:[#allocation2] sm:$0xff]  ;;  %v156_v16 = vld [vmem:[#allocation5 + $0x8] sm:$0xff]  ;;  %p391_p7 = scmp.lt.s32.totalorder %s231_s24, %s231_s24 }
  0x36   :  { %v84_v13 = vld [vmem:[#allocation2 + $0x8] sm:$0xff]  ;;  %287 = vmatpush3.bf16.msra.mxu1 %v163_v8  ;;  %280 = vmatprep.subr.bf16.mxu0 %v442_v0  ;;  %v162_v14 = vpack.c.bf16 %v158_v10, %v157_v9  ;;  %v161_v18 = vpack.c.bf16 %v156_v16, %v155_v15  ;;  %v260_v19 = vld [vmem:[%s531_s3] ss:$0 sm:$0xff]  ;;  %s445_s3 = smov [#allocation11]  }
  0x37   :  { %288 = vmatprep.subr.bf16.mxu1 %v442_v0  ;;  %v89_v17 = vpack.c.bf16 %v84_v13, %v83_v12  ;;  %v264_v20 = vld [vmem:[%s533_s5] ss:$0 sm:$0xff]  ;;  %s242_s25 = sshll.u32 %s445_s3, 4  ;;  %s386_s5 = scalar_lea.vmem %s231_s24, 128  ;;  %s243_s25 = int_to_ptr.vmem [resolvable:$true] %s242_s25 }
  0x38   :  { %p387_p6 = scmp.ne.s32.totalorder %s231_s24, %s386_s5  ;;  %p392_p8 = scmp.lt.s32.totalorder %s386_s5, %s386_s5 }
  0x39   :  { %281 = vmatpush3.bf16.msra.mxu0 %v90_v11 }
  0x3a   :  { %289 = vmatpush3.bf16.msra.mxu1 %v162_v14  ;;  %p393_p9 = por %p392_p8, %p391_p7 }
  0x3c   :  { %283 = vmatmul.mubr.msk.bf16.vlgmr.msra.gmra.mxu0 %vm99_vm1, %v89_v17  ;;  %p394_p10 = pnand %p393_p9, %p387_p6 }
  0x3d   :  { %291 = vmatmul.mubr.msk.bf16.vlgmr.msra.gmra.mxu1 %vm99_vm1, %v161_v18 }
  0xfc   :  { %v137_v21 = vpop.f32.mrf.mxu0 }
  0xfd   :  { %v138_v22 = vadd.f32 %v260_v19, %v137_v21  ;;  %v208_v23 = vpop.f32.mrf.mxu1 }
  0xfe   :  { %v209_v24 = vadd.f32 %v264_v20, %v208_v23  ;;  %v284_v25 = vpop.f32.mrf.mxu0 }
  0xff   :  { %v268_v26 = vpack.c.bf16 %v138_v22, %v138_v22  ;;  %v292_v27 = vpop.f32.mrf.mxu1 }
 0x100   :  { %v270_v28 = vpack.c.bf16 %v209_v24, %v209_v24  ;;  %v140_v29 = vpop.f32.mrf.mxu0 }
 0x101   :  { %153 = vst.msk [vmem:[#allocation10] sm:$0xf] %vm152_vm2, %v268_v26  ;;  %v141_v30 = vadd.f32 %v260_v19, %v140_v29  ;;  %v211_v31 = vpop.f32.mrf.mxu1 }
 0x102   :  { %223 = vst.msk [vmem:[#allocation11] sm:$0xf] %vm152_vm2, %v270_v28  ;;  %v212_v32 = vadd.f32 %v264_v20, %v211_v31  ;;  %v285_v33 = vpop.f32.mrf.mxu0 }
 0x103   :  { %v269_v34 = vpack.c.bf16 %v141_v30, %v141_v30  ;;  %v293_v35 = vpop.f32.mrf.mxu1 }
 0x104   :  { %v271_v36 = vpack.c.bf16 %v212_v32, %v212_v32 }
 0x105   :  { %154 = vst.msk [vmem:[#allocation10 + $0x4] sm:$0xf] %vm152_vm2, %v269_v34 }
 0x106   :  { %224 = vst.msk [vmem:[#allocation11 + $0x4] sm:$0xf] %vm152_vm2, %v271_v36 }
 0x107   :  { %397 = shalt.err (!%p394_p10)
}
 0x108   :  { %s446_s26 = smov 64   ;;  %s447_s27 = smov 4  }
 0x109   :  { %236 = dma.vmem_to_hbm [thread:$0]  %s231_s24, 128, %s534_s6, [#allocation4], %s446_s26, %s446_s26, %s447_s27  }
 0x10a   :  { %s406_s30 = scalar_lea.vmem %s243_s25, 128  ;;  %p411_p12 = scmp.lt.s32.totalorder %s243_s25, %s243_s25 }
 0x10b   :  { %p407_p11 = scmp.ne.s32.totalorder %s243_s25, %s406_s30  ;;  %p412_p13 = scmp.lt.s32.totalorder %s406_s30, %s406_s30 }
 0x10d   :  { %p413_p0 = por %p412_p13, %p411_p12 }
 0x10f   :  { %p414_p1 = pnand %p413_p0, %p407_p11 }
 0x111   :  { %417 = shalt.err (!%p414_p1)
}
 0x112   :  { %248 = dma.vmem_to_hbm [thread:$0]  %s243_s25, 128, %s535_s7, [#allocation12], %s446_s26, %s446_s26, %s447_s27  }
 0x113   :  { %432 = dma.done.wait [#allocation4], 128  }
 0x114   :  { %433 = vsyncadd [#allocation4], 4294967168 }
 0x115   :  { %434 = dma.done.wait [#allocation12], 128  }
 0x116   :  { %435 = vsyncadd [#allocation12], 4294967168 }
 0x117   :  { %255 = vsyncpa [#allocation3], 1 }
 0x118   :  { %256 = vsyncpa [#allocation6], 1 }
 0x119   :  { %257 = vsyncpa [#allocation9], 1 }
 0x11a   :  { %258 = vsyncpa [#allocation4], 1 }
 0x11b   :  { %259 = vsyncpa [#allocation12], 1 }

</bundles_post_ra>
